<compile_context>
chip_gen: v7x
topology: tpu7x:2x2x1
jax: 0.10.0
libtpu: 0.0.40
codegen_flags: <defaults>
</compile_context>

<pallas_src>
import math

import jax
import jax.numpy as jnp
from jax.experimental import pallas as pl
from jax.experimental.pallas import tpu as pltpu


# ---------------------------------------------------------------------------
# Per-generation budgets.
# ---------------------------------------------------------------------------
def _device_config():
    """v5e/v6e: 128 MiB VMEM -> big blocks; v7x: 64 MiB/TC -> smaller blocks."""
    try:
        vmem_bytes = int(pltpu.get_tpu_info().vmem_capacity_bytes)
    except Exception:
        vmem_bytes = 64 * 1024 * 1024  # conservative (v7x-safe) fallback
    if vmem_bytes >= 100 * 1024 * 1024:  # v5e / v6e
        return {"block_cap": 8 << 20, "vmem_limit": 64 << 20, "max_tile": 1024}
    return {"block_cap": 4 << 20, "vmem_limit": 48 << 20, "max_tile": 512}


_CFG = _device_config()


def _sublane_min(itemsize):
    # (8,128) minimum tile for 32-bit, (16,128) for bf16, (32,128) for int8/fp8.
    return max(8, 32 // max(1, itemsize))


# ---------------------------------------------------------------------------
# Path A: generic 2-D  y = x @ W^T + b  with M/N/K tiling.
# ---------------------------------------------------------------------------
def _matmul_bias_f32_kernel(x_ref, w_ref, b_ref, o_ref):
    # f32 output: accumulate directly into the resident output block (its
    # block index is K-invariant), seeded with the bias on the first K step.
    k = pl.program_id(2)

    @pl.when(k == 0)
    def _():
        o_ref[...] = jnp.broadcast_to(b_ref[...], o_ref.shape)

    o_ref[...] += jnp.dot(
        x_ref[...], w_ref[...], preferred_element_type=jnp.float32
    )


def _matmul_bias_acc_kernel(x_ref, w_ref, b_ref, o_ref, acc_ref):
    # Non-f32 output: keep an f32 VMEM accumulator, cast on the last K step.
    k = pl.program_id(2)

    @pl.when(k == 0)
    def _():
        acc_ref[...] = jnp.zeros_like(acc_ref)

    acc_ref[...] += jnp.dot(
        x_ref[...], w_ref[...], preferred_element_type=jnp.float32
    )

    @pl.when(k == pl.num_programs(2) - 1)
    def _():
        o_ref[...] = (acc_ref[...] + b_ref[...]).astype(o_ref.dtype)


def _pick_tiles_2d(n, c_in, c_out, itemsize):
    block_cap = _CFG["block_cap"]
    max_tile = _CFG["max_tile"]
    sub = _sublane_min(itemsize)

    # K tile: INVARIANT — must divide c_in exactly (the K grid is c_in//tile_k,
    # never ragged). Prefer 512/256 so the 256x256 MXU (v6e/v7x) is filled.
    tile_k = c_in
    for cand in (512, 256, 128):
        if c_in % cand == 0:
            tile_k = cand
            break
    # TODO(synk): for large non-128-multiple c_in, zero-pad K once at init
    # instead of contracting over the full c_in in one block.

    # C_out tile (lane axis of the output): 256-granular when possible,
    # ragged last block is masked on store so it need not divide c_out.
    if c_out >= 128:
        gran = 256 if c_out >= 256 else 128
        tile_co = min(max_tile, (c_out // gran) * gran)
        max_co = max(gran, (block_cap // (tile_k * itemsize)) // gran * gran)
        tile_co = min(tile_co, max_co)
    else:
        tile_co = c_out  # full dim is always a legal block

    # N tile (sublane axis): byte-budgeted, dtype-aware sublane granularity.
    max_rows = max(sub, (block_cap // (tile_k * itemsize)) // sub * sub)
    if n <= min(max_tile, max_rows):
        tile_n = n  # single full block along rows (always legal)
    else:
        tile_n = (min(max_tile, max_rows) // sub) * sub

    return tile_n, tile_k, tile_co


@jax.jit
def _linear_2d(x2d, w_t, bias2d):
    """x2d: (N, C_in), w_t: (C_in, C_out), bias2d: (1, C_out) -> (N, C_out)."""
    n, c_in = x2d.shape
    c_out = w_t.shape[1]
    itemsize = jnp.dtype(x2d.dtype).itemsize
    tile_n, tile_k, tile_co = _pick_tiles_2d(n, c_in, c_out, itemsize)

    assert c_in % tile_k == 0, "K axis must never be ragged"
    grid = (pl.cdiv(n, tile_n), pl.cdiv(c_out, tile_co), c_in // tile_k)

    f32_out = jnp.dtype(x2d.dtype) == jnp.dtype(jnp.float32)
    if f32_out:
        kernel = _matmul_bias_f32_kernel
        scratch = []
    else:
        kernel = _matmul_bias_acc_kernel
        scratch = [pltpu.VMEM((tile_n, tile_co), jnp.float32)]

    return pl.pallas_call(
        kernel,
        out_shape=jax.ShapeDtypeStruct((n, c_out), x2d.dtype),
        grid_spec=pltpu.PrefetchScalarGridSpec(
            num_scalar_prefetch=0,
            grid=grid,
            in_specs=[
                pl.BlockSpec((tile_n, tile_k), lambda i, j, k: (i, k)),
                pl.BlockSpec((tile_k, tile_co), lambda i, j, k: (k, j)),
                pl.BlockSpec((1, tile_co), lambda i, j, k: (0, j)),
            ],
            out_specs=pl.BlockSpec((tile_n, tile_co), lambda i, j, k: (i, j)),
            scratch_shapes=scratch,
        ),
        compiler_params=pltpu.CompilerParams(
            dimension_semantics=("parallel", "parallel", "arbitrary"),
            vmem_limit_bytes=_CFG["vmem_limit"],
        ),
    )(x2d, w_t, bias2d)


# ---------------------------------------------------------------------------
# Path B: channels-first N-D inputs, no transposes. Computes
#   y[b, :, s_tile] = W @ x[b, :, s_tile] + bias
# with the (large) flattened spatial axis as the lane axis.
# ---------------------------------------------------------------------------
def _cf_linear_kernel(w_ref, b_ref, x_ref, o_ref):
    # w_ref: (C_out, C_in), x_ref: (C_in, TILE_S), b_ref: (C_out, 1)
    acc = jnp.dot(w_ref[...], x_ref[...], preferred_element_type=jnp.float32)
    o_ref[...] = (acc + b_ref[...]).astype(o_ref.dtype)


@jax.jit
def _linear_channels_first(x3, w, bias_col):
    """x3: (B, C_in, S), w: (C_out, C_in), bias_col: (C_out, 1) -> (B, C_out, S)."""
    b, c_in, s = x3.shape
    c_out = w.shape[0]
    itemsize = jnp.dtype(x3.dtype).itemsize
    block_cap = _CFG["block_cap"]

    if s >= 128:
        # Memory-bound: largest lane-dense tile the per-chip block budget
        # allows (no artificial cap) — amortizes per-step overhead.
        max_lanes = max(
            128, (block_cap // (max(c_in, c_out) * itemsize)) // 128 * 128
        )
        tile_s = min((s // 128) * 128, max_lanes)
        if b == 1 and s >= 256:
            # Keep >= 2 spatial blocks so both TensorCores (v7x) / megacore
            # halves get work when there is a single batch element.
            half = max(128, ((s // 2) // 128) * 128)
            tile_s = min(tile_s, half)
    else:
        tile_s = s  # full dim is always a legal block

    grid = (b, pl.cdiv(s, tile_s))

    return pl.pallas_call(
        _cf_linear_kernel,
        out_shape=jax.ShapeDtypeStruct((b, c_out, s), x3.dtype),
        grid_spec=pltpu.PrefetchScalarGridSpec(
            num_scalar_prefetch=0,
            grid=grid,
            in_specs=[
                pl.BlockSpec((c_out, c_in), lambda i, j: (0, 0)),
                pl.BlockSpec((c_out, 1), lambda i, j: (0, 0)),
                pl.BlockSpec((None, c_in, tile_s), lambda i, j: (i, 0, j)),
            ],
            out_specs=pl.BlockSpec((None, c_out, tile_s), lambda i, j: (i, 0, j)),
        ),
        compiler_params=pltpu.CompilerParams(
            dimension_semantics=("parallel", "parallel"),
            vmem_limit_bytes=_CFG["vmem_limit"],
        ),
    )(w, bias_col, x3)


def reorder_dimensions(shape_len):
    order = list(range(shape_len))
    order = [0] + order[2:] + [1]
    inverse_order = [order.index(i) for i in range(shape_len)]
    return order, inverse_order


class PallasLinear:
    """Mirrors models/Custumnn.py::Linear (nn.Linear applied to the channel dim)."""

    def __init__(self, in_features, out_features, key):
        self.in_features = in_features
        self.out_features = out_features
        # nn.Linear default init: U(-1/sqrt(fan_in), 1/sqrt(fan_in)).
        k_w, k_b = jax.random.split(key)
        bound = 1.0 / math.sqrt(in_features)
        # PyTorch stores weight as (out, in).
        self.weight = jax.random.uniform(
            k_w, (out_features, in_features), jnp.float32, -bound, bound
        )
        self.bias = jax.random.uniform(
            k_b, (out_features,), jnp.float32, -bound, bound
        )
        # Cached layouts — computed once, not per forward call.
        self.weight_t = jnp.transpose(self.weight)            # (C_in, C_out)
        self.bias_row = self.bias.reshape(1, out_features)    # (1, C_out)
        self.bias_col = self.bias.reshape(out_features, 1)    # (C_out, 1)
        # Transpose-free channels-first path is used while the whole weight
        # fits the per-chip block budget (stays VMEM resident).
        itemsize = jnp.dtype(self.weight.dtype).itemsize
        self._use_cf = in_features * out_features * itemsize <= _CFG["block_cap"]
        # TODO(synk): add a K-tiled channels-first kernel so even very large
        # weights avoid the permute-channels-last fallback.

    def _apply_2d(self, x2d):
        return _linear_2d(x2d, self.weight_t, self.bias_row)

    def __call__(self, x):
        if x.ndim == 1:
            return self._apply_2d(x.reshape(1, -1)).reshape(self.out_features)
        if x.ndim == 2:
            return self._apply_2d(x)

        # N-D input with channels in dim 1. PyTorch permutes channels last,
        # applies the linear, permutes back -> a per-position linear on dim 1.
        batch = x.shape[0]
        spatial = x.shape[2:]
        s = 1
        for d in spatial:
            s *= int(d)

        if self._use_cf:
            # Fast path: reshape only (free), never transpose. Output is
            # produced directly in channels-first layout.
            x3 = x.reshape(batch, self.in_features, s)
            y3 = _linear_channels_first(x3, self.weight, self.bias_col)
            return y3.reshape(batch, self.out_features, *spatial)

        # Large-weight fallback: transpose channels last, run the tiled
        # matmul, transpose back (matches PyTorch permute semantics).
        order, inverse_order = reorder_dimensions(x.ndim)
        xt = jnp.transpose(x, order)
        lead = xt.shape[:-1]
        y = self._apply_2d(xt.reshape(-1, self.in_features))
        y = y.reshape(*lead, self.out_features)
        return jnp.transpose(y, inverse_order)


if __name__ == "__main__":
    key = jax.random.PRNGKey(0)
    k_param, k_x, k_x2 = jax.random.split(key, 3)

    in_features, out_features = 4, 8
    model = PallasLinear(in_features, out_features, k_param)

    # NCHW input, channels = in_features (channels-first fast path).
    x = jax.random.normal(k_x, (2, 4, 16, 16), jnp.float32)
    y = jax.block_until_ready(model(x))
    assert y.shape == (2, 8, 16, 16), y.shape

    # Reference: same math as torch permute + linear + permute.
    x_perm = jnp.transpose(x, (0, 2, 3, 1))
    y_ref = jnp.einsum("bhwc,oc->bhwo", x_perm, model.weight) + model.bias
    y_ref = jnp.transpose(y_ref, (0, 3, 1, 2))
    assert jnp.allclose(y, y_ref, atol=1e-5, rtol=1e-5)

    # Plain 2-D input (tiled matmul path, f32 accumulate-into-output kernel).
    x2 = jax.random.normal(k_x2, (16, 4), jnp.float32)
    y2 = jax.block_until_ready(model(x2))
    y2_ref = x2 @ model.weight.T + model.bias
    assert y2.shape == (16, 8), y2.shape
    assert jnp.allclose(y2, y2_ref, atol=1e-5, rtol=1e-5)

    print("KERNEL_OK")
</pallas_src>

<mosaic_0001>
module attributes {stable_mosaic.version = 11 : i64} {
  func.func @_cf_linear_kernel(%arg0: i32, %arg1: i32, %arg2: memref<8x4xf32, #tpu.memory_space<vmem>>, %arg3: memref<8x1xf32, #tpu.memory_space<vmem>>, %arg4: memref<1x4x256xf32, #tpu.memory_space<vmem>>, %arg5: memref<1x8x256xf32, #tpu.memory_space<vmem>>) attributes {dimension_semantics = [#tpu.dimension_semantics<parallel>, #tpu.dimension_semantics<parallel>], iteration_bounds = array<i64: 2, 1>, scalar_prefetch = 0 : i64, scratch_operands = 0 : i64, tpu.core_type = #tpu.core_type<tc>, window_params = [{pipeline_mode = #tpu.pipeline_mode<synchronous>, transform_indices = @transform_0, window_bounds = array<i64: 8, 4>}, {pipeline_mode = #tpu.pipeline_mode<synchronous>, transform_indices = @transform_1, window_bounds = array<i64: 8, 1>}, {transform_indices = @transform_2, window_bounds = array<i64: 1, 4, 256>}, {transform_indices = @transform_3, window_bounds = array<i64: 1, 8, 256>}]} {
    %c0 = arith.constant 0 : index
    %c0_0 = arith.constant 0 : index
    %0 = vector.load %arg2[%c0, %c0_0] : memref<8x4xf32, #tpu.memory_space<vmem>>, vector<8x4xf32>
    %c0_1 = arith.constant 0 : index
    %c0_2 = arith.constant 0 : index
    %c0_3 = arith.constant 0 : index
    %1 = vector.load %arg4[%c0_1, %c0_2, %c0_3] : memref<1x4x256xf32, #tpu.memory_space<vmem>>, vector<1x4x256xf32>
    %2 = vector.shape_cast %1 : vector<1x4x256xf32> to vector<4x256xf32>
    %cst = arith.constant dense<0.000000e+00> : vector<8x256xf32>
    %3 = tpu.matmul %0, %2, %cst {dimension_numbers = #tpu.dot_dimension_numbers<[1], [0], [0], [1], [0, 0, 1, 1], [], []>} : vector<8x4xf32>, vector<4x256xf32>, vector<8x256xf32> -> vector<8x256xf32>
    %c0_4 = arith.constant 0 : index
    %c0_5 = arith.constant 0 : index
    %4 = vector.load %arg3[%c0_4, %c0_5] : memref<8x1xf32, #tpu.memory_space<vmem>>, vector<8x1xf32>
    %5 = vector.broadcast %4 : vector<8x1xf32> to vector<8x256xf32>
    %6 = arith.addf %3, %5 : vector<8x256xf32>
    %c0_6 = arith.constant 0 : index
    %c0_7 = arith.constant 0 : index
    %c0_8 = arith.constant 0 : index
    %7 = vector.load %arg5[%c0_6, %c0_7, %c0_8] : memref<1x8x256xf32, #tpu.memory_space<vmem>>, vector<1x8x256xf32>
    %8 = vector.shape_cast %7 : vector<1x8x256xf32> to vector<8x256xf32>
    %9 = vector.shape_cast %6 : vector<8x256xf32> to vector<1x8x256xf32>
    tpu.vector_store %arg5[%c0_6, %c0_7, %c0_8], %9 {strides = array<i32>} : memref<1x8x256xf32, #tpu.memory_space<vmem>>, vector<1x8x256xf32>,
    return
  }
  func.func @transform_0(%arg0: i32, %arg1: i32) -> (i32, i32) {
    %c0_i32 = arith.constant 0 : i32
    %c0_i32_0 = arith.constant 0 : i32
    %c0_i32_1 = arith.constant 0 : i32
    return %c0_i32, %c0_i32_0 : i32, i32
  }
  func.func @transform_1(%arg0: i32, %arg1: i32) -> (i32, i32) {
    %c0_i32 = arith.constant 0 : i32
    %c0_i32_0 = arith.constant 0 : i32
    %c0_i32_1 = arith.constant 0 : i32
    return %c0_i32, %c0_i32_0 : i32, i32
  }
  func.func @transform_2(%arg0: i32, %arg1: i32) -> (i32, i32, i32) {
    %c0_i32 = arith.constant 0 : i32
    %c0_i32_0 = arith.constant 0 : i32
    return %arg0, %c0_i32, %arg1 : i32, i32, i32
  }
  func.func @transform_3(%arg0: i32, %arg1: i32) -> (i32, i32, i32) {
    %c0_i32 = arith.constant 0 : i32
    %c0_i32_0 = arith.constant 0 : i32
    return %arg0, %c0_i32, %arg1 : i32, i32, i32
  }
}

</mosaic_0001>

<bundles_post_ra>
// kernel: _linear_channels_first.1
= control target key start
LH: loop header
LB: loop body
LE: loop exit
PB: predicated region body
PF: predicated region fallthrough
CT: control target
= control target key end

     0   :  { %8 = vsyncpa [#allocation3], 0  ;;  %s683_s0 = inlined_call_operand.vmem [shape: f32[8,4], index: 0, kind: input, shape index: {}]   ;;  %s684_s1 = inlined_call_operand.vmem [shape: f32[8,1], index: 1, kind: input, shape index: {}]   ;;  %s685_s2 = inlined_call_operand.vmem [shape: f32[2,4,256], index: 2, kind: input, shape index: {}]   ;;  %s686_s3 = inlined_call_operand.hbm [shape: f32[2,8,256], index: 3, kind: output, shape index: {}]  }
   0x1   :  { %10 = vsyncpa [#allocation3 + $0x1], 0  ;;  %s565_s12 = smov 0   ;;  %s567_s13 = smov 0  }
   0x2   :  { %s569_s14 = smov 0   ;;  %s571_s15 = smov 0  }
   0x3   :  { %s573_s16 = smov 0   ;;  %s575_s17 = smov 0  }
   0x4 LB: > { %s385_s18 = sadd.s32 4294967295, %s540_s17   ;;  %s386_s19 = sadd.s32 4294967294, %s540_s17   ;;  %s540_s17 = sphi %s575_s17, %s16_s17   ;;  %s536_s16 = sphi %s573_s16, %s693_s16   ;;  %s532_s15 = sphi %s571_s15, %s692_s15   ;;  %s528_s14 = sphi %s569_s14, %s691_s14   ;;  %s524_s13 = sphi %s567_s13, %s690_s13   ;;  %s520_s12 = sphi %s565_s12, %s689_s12  }
   0x5   : > { %s28_s20 = sadd.s32 1, %s536_s16  ;;  %s107_s21 = sadd.s32 1, %s528_s14 }
   0x6   : > { %p30_p0 = scmp.ge.s32.totalorder %s28_s20, 2  ;;  %p117_p1 = scmp.ne.s32.totalorder %s528_s14, %s524_s13 }
   0x7   : > { %p118_p2 = scmp.eq.s32.totalorder %s385_s18, 1  ;;  %p123_p3 = scmp.ne.s32.totalorder %s524_s13, %s520_s12 }
   0x8   : > { %s695_s20 = smov (%p30_p0, %s28_s20), 0  ;;  %p124_p5 = scmp.eq.s32.totalorder %s386_s19, 1 }
   0x9   : > { %p605_p4 = por %p118_p2, %p117_p1  ;;  %s102_s23 = ssub.s32 %s536_s16, %s695_s20 }
   0xa   : > { %p389_p6 = scmp.ge.s32.totalorder %s540_s17, 1  ;;  %p105_p7 = scmp.eq.s32.totalorder %s102_s23, 0 }
   0xb   : > { %p612_p8 = por %p124_p5, %p123_p3  ;;  %p161_p9 = scmp.lt.s32.totalorder %s540_s17, 3 }
   0xc   : > { %s618_s25 = scalar_select %p105_p7, %s528_s14, %s107_s21  }
   0xd   : > { %p162_p10 = pnand %p389_p6, %p161_p9 }
   0xe   : > { %p190_p11 = scmp.lt.s32.totalorder (!%p162_p10), %s532_s15, 1  ;;  %v542_v0 = vmov (!%p162_p10), 0.0   ;;  %v543_v1 = vmov (!%p162_p10), 0   ;;  %v202_v2 = vld [vmem:[%s684_s1] sm:$0xff] (!%p162_p10)  ;;  %vm214_vm0 = vcmask (!%p162_p10), 1043456   ;;  %vm210_vm1 = vcmask (!%p162_p10), 31744  }
   0xf   : > { %165 = sbr.rel (%p162_p10) target bundleno = 260 (0x104), region = 32  ;;  %283 = vmatprep.mubr.f32.mxu0 (!%p162_p10), %v542_v0  ;;  %460 = vset.pattern.permute.xlu0 (!%p162_p10), %v543_v1  ;;  %v200_v5 = vld [vmem:[%s683_s0] sm:$0xff] (!%p162_p10)  ;;  %s186_s8 = sand.u32 (!%p162_p10), 1, %s524_s13  }
  0x10   : > { %205 = vperm.xlu0 (!%p162_p10), %460, %v202_v2   ;;  %s390_s9 = sshll.u32 (!%p162_p10), %s186_s8, 4  ;;  %s402_s10 = sshll.u32 (!%p162_p10), %s532_s15, 8 }
  0x11   : > { %s188_s11 = scalar_lea.vmem (!%p162_p10), [#allocation2], %s390_s9  ;;  %s636_s23 = scalar_lea.hbm (!%p162_p10), %s686_s3, %s402_s10 }
  0x12   : > { %s309_s18 = sshll.u32 (!%p162_p10), %s188_s11, 4  ;;  %s293_s26 = scalar_lea.sflag (!%p162_p10), [#allocation3], %s186_s8  ;;  %s638_s18 = int_to_ptr.vmem [resolvable:$true] %s309_s18 }
  0x13   : > { %s544_s27 = smov (!%p162_p10), [#allocation2]  }
  0x16   : > { %s191_s28 = scalar_select %p190_p11, %s532_s15, 1 }
  0x17   : > { %s462_s15 = scalar_lea.vmem %s638_s18, 256 }
  0x18   : > { %s401_s29 = sshll.u32 %s191_s28, 3  ;;  %p463_p12 = scmp.ne.s32.totalorder %s638_s18, %s462_s15 }
  0x19   : > { %s197_s5 = scalar_lea.vmem %s685_s2, %s401_s29  ;;  %s466_s28 = sshll.u32 %s544_s27, 4  ;;  %s467_s28 = int_to_ptr.vmem [resolvable:$false] %s466_s28 }
  0x1a   : > { %v201_v3 = vld [vmem:[%s197_s5] sm:$0xff]  ;;  %p464_p13 = pnand %p463_p12, %p605_p4  ;;  %s468_s29 = scalar_lea.vmem %s467_s28, 512 }
  0x1b   : > { %v209_v4 = vcombine.high %v201_v3, %v201_v3  ;;  %p469_p1 = scmp.lt.s32.totalorder %s638_s18, %s467_s28  ;;  %p470_p2 = scmp.lt.s32.totalorder %s468_s29, %s462_s15 }
  0x1c   : > { %p465_p0 = pneg %p464_p13 }
  0x1d   : > { %393 = vmatprep.subr.msk.mxu0 %vm214_vm0, %v209_v4  ;;  %p471_p3 = por %p470_p2, %p469_p1 }
  0x1e   : > { %394 = vmatpush1.msk.msra.mxu0 %vm214_vm0, %v201_v3 }
  0x1f   : > { %395 = vmatmul.mubr.msk.f32.vlgmr.msra.gmra.mrb[0].mxu0 %vm210_vm1, %v200_v5  ;;  %p472_p5 = pnand %p471_p3, %p465_p0 }
  0x8f   : > { %v206_v6 = vpop.permute.xlu0 %205 }
  0xf2   : > { %v285_v7 = vpop.f32.mrb[0].mxu0 }
  0xf3   : > { %v286_v8 = vadd.f32 %v285_v7, %v206_v6  ;;  %v287_v9 = vpop.f32.mrb[1].mxu0 }
  0xf4   : > { %v288_v10 = vadd.f32 %v287_v9, %v206_v6 }
  0xf5   : > { %290 = vst [vmem:[%s188_s11] sm:$0xff] %v286_v8 }
  0xf6   : > { %291 = vst [vmem:[%s188_s11 + $0x8] sm:$0xff] %v288_v10 }
  0xf7   : > { %475 = shalt.err (!%p472_p5)
}
  0xf8   : > { %s476_s30 = scalar_lea.hbm %s636_s23, 256  ;;  %s480_s6 = scalar_lea.hbm %s686_s3, 512 }
  0xf9   : > { %p477_p6 = scmp.ne.s32.totalorder %s636_s23, %s476_s30  ;;  %p481_p10 = scmp.lt.u32.totalorder %s636_s23, %s686_s3 }
  0xfa   : > { %p482_p11 = scmp.lt.u32.totalorder %s480_s6, %s476_s30  ;;  %p484_p13 = scmp.lt.u32.totalorder %s476_s30, %s636_s23 }
  0xfb   : > { %p478_p7 = pnand %p477_p6, %p605_p4 }
  0xfc   : > { %p483_p12 = por %p482_p11, %p481_p10 }
  0xfd   : > { %p479_p9 = pneg %p478_p7 }
  0xfe   : > { %p485_p0 = por %p484_p13, %p483_p12 }
 0x100   : > { %p486_p1 = pnand %p485_p0, %p479_p9 }
 0x102   : > { %489 = shalt.err (!%p486_p1)
}
 0x103   : > { %403 = dma.vmem_to_hbm [thread:$0]  (%p605_p4), %s638_s18, 256, %s636_s23, %s293_s26  }
 0x104 PF: > { %p409_p2 = scmp.ge.s32.totalorder %s540_s17, 2  ;;  %s321_s9 = sand.u32 1, %s520_s12  }
 0x105   : > { %s322_s10 = scalar_lea.sflag [#allocation3], %s321_s9 }
 0x106   : > { %p406_p3 = pnand %p409_p2, %p612_p8 }
 0x108   : > { %515 = dma.done.wait (!%p406_p3), %s322_s10, 256  }
 0x109   : > { %517 = vsyncadd (!%p406_p3), %s322_s10, 4294967040  ;;  %s16_s17 = sadd.s32 1, %s540_s17   ;;  %s689_s12 = smov %s524_s13 }
 0x10a   : > { %p13_p5 = scmp.ge.s32.totalorder %s16_s17, 4   ;;  %s690_s13 = smov %s528_s14 }
 0x10b   : > { %s691_s14 = smov %s618_s25  ;;  %s692_s15 = smov %s536_s16 }
 0x10c   : > { %s693_s16 = smov %s695_s20  ;;  %15 = sbr.rel (!%p13_p5) target bundleno = 4 (0x4), region = 67 }
 0x113   :  { %327 = vsyncpa [#allocation3], 1 }
 0x114   :  { %329 = vsyncpa [#allocation3 + $0x1], 1 }

</bundles_post_ra>
